<compile_context>
chip_gen: v5e
topology: v5e:2x2
jax: 0.10.0
libtpu: 0.0.40
codegen_flags: <defaults>
</compile_context>

<pallas_src>
import functools

import jax
import jax.numpy as jnp
from jax.experimental import pallas as pl
from jax.experimental.pallas import tpu as pltpu


def _round_up(x, m):
    return (x + m - 1) // m * m


def _centerloss_tile_kernel(label_ref, feat_ref, centers_ref, part_ref):
    """One batch tile: per-column partial sums of (feat - centers[label])^2.

    label_ref:   (TB, 1)  int32   (padded rows carry label == C)
    feat_ref:    (TB, Dp) feat dtype (bf16/f32); padded rows/lanes are zero
    centers_ref: (C,  Dp) float32; resident across the grid
    part_ref:    (1, 1, Dp) float32 per-tile partial output (lane-dense)
    """
    feat = feat_ref[...].astype(jnp.float32)          # (TB, Dp)
    centers = centers_ref[...]                        # (C,  Dp) f32
    labels = label_ref[...]                           # (TB, 1) int32

    TB, Dp = feat.shape
    C = centers.shape[0]

    # Gather centers[label] via one-hot matmul on the MXU.  Out-of-range labels
    # (including the padding sentinel C) select nothing -> zero row -> zero
    # contribution (note: PyTorch indexing would instead raise).
    class_ids = jax.lax.broadcasted_iota(jnp.int32, (TB, C), 1)     # (TB, C)
    onehot = (labels == class_ids).astype(jnp.float32)              # (TB, C)
    centers_batch = jnp.dot(onehot, centers,
                            preferred_element_type=jnp.float32)     # (TB, Dp)

    diff = feat - centers_batch
    d2 = diff * diff                                                # (TB, Dp)

    # Only reduce over the rows of this tile; the final cross-lane reduce and
    # the 0.5 / B scaling happen once in the wrapper.
    part_ref[0] = jnp.sum(d2, axis=0, keepdims=True)                # (1, Dp)


def center_loss(label, feat, centers, size_average=True, tile_b=256):
    """Pallas implementation of CenterLoss.forward.

    label:   (B,) integer labels
    feat:    (B, ...) features, flattened to (B, feat_dim); NOT upcast here
    centers: (num_classes, feat_dim)
    """
    B = feat.shape[0]
    feat2d = feat.reshape(B, -1)
    D = feat2d.shape[1]
    C = centers.shape[0]
    if D != centers.shape[1]:
        raise ValueError(
            "Center's dim: {0} should be equal to input feature's dim: {1}".format(
                centers.shape[1], D))

    # Lane/sublane-friendly padding.
    Dp = _round_up(D, 128)
    TB = _round_up(min(tile_b, _round_up(B, 8)), 8)
    Bp = _round_up(B, TB)
    num_tiles = Bp // TB

    feat_p = jnp.zeros((Bp, Dp), feat2d.dtype).at[:B, :D].set(feat2d)
    centers_p = (jnp.zeros((C, Dp), jnp.float32)
                 .at[:, :D].set(centers.astype(jnp.float32)))
    # Sentinel label C for padded rows -> all-zero one-hot -> zero contribution.
    label_p = jnp.full((Bp, 1), C, dtype=jnp.int32).at[:B, 0].set(
        label.astype(jnp.int32))

    feat_bytes = feat_p.dtype.itemsize
    cost = pl.CostEstimate(
        flops=2 * Bp * C * Dp + 3 * Bp * Dp,
        transcendentals=0,
        bytes_accessed=(Bp * Dp * feat_bytes      # feat read
                        + C * Dp * 4              # centers read (once)
                        + Bp * 4                  # labels read
                        + num_tiles * Dp * 4),    # partials written
    )

    partials = pl.pallas_call(
        _centerloss_tile_kernel,
        out_shape=jax.ShapeDtypeStruct((num_tiles, 1, Dp), jnp.float32),
        grid=(num_tiles,),
        in_specs=[
            pl.BlockSpec((TB, 1), lambda i: (i, 0)),    # labels (tiled)
            pl.BlockSpec((TB, Dp), lambda i: (i, 0)),   # feat tile (pipelined)
            pl.BlockSpec((C, Dp), lambda i: (0, 0)),    # centers (resident)
        ],
        out_specs=pl.BlockSpec((1, 1, Dp), lambda i: (i, 0, 0)),
        compiler_params=pltpu.CompilerParams(
            dimension_semantics=("parallel",),          # shard tiles on v7x TCs
            vmem_limit_bytes=32 * 1024 * 1024,
        ),
        cost_estimate=cost,
    )(label_p, feat_p, centers_p)

    denom = float(B if size_average else 1)
    return 0.5 * jnp.sum(partials) / denom


if __name__ == "__main__":
    # Small, deterministic shapes consistent with the module.
    num_classes = 5
    feat_dim = 32
    batch = 8

    key = jax.random.PRNGKey(0)
    k_centers, k_feat, k_label = jax.random.split(key, 3)

    # nn.Parameter(torch.randn(num_classes, feat_dim)) -> normal init
    centers = jax.random.normal(k_centers, (num_classes, feat_dim), dtype=jnp.float32)
    feat = jax.random.normal(k_feat, (batch, feat_dim), dtype=jnp.float32)
    label = jax.random.randint(k_label, (batch,), 0, num_classes, dtype=jnp.int32)

    loss = center_loss(label, feat, centers, size_average=True)
    loss = jax.block_until_ready(loss)

    # Pure-JAX reference check.
    ref = jnp.sum((feat - centers[label]) ** 2) / 2.0 / batch
    assert jnp.allclose(loss, ref, rtol=1e-5, atol=1e-5), (loss, ref)

    print("KERNEL_OK")
</pallas_src>

<mosaic_0001>
module attributes {stable_mosaic.version = 11 : i64} {
  func.func @_centerloss_tile_kernel(%arg0: i32, %arg1: memref<8x1xi32, #tpu.memory_space<vmem>>, %arg2: memref<8x128xf32, #tpu.memory_space<vmem>>, %arg3: memref<5x128xf32, #tpu.memory_space<vmem>>, %arg4: memref<1x1x128xf32, #tpu.memory_space<vmem>>) attributes {dimension_semantics = [#tpu.dimension_semantics<parallel>], iteration_bounds = array<i64: 1>, scalar_prefetch = 0 : i64, scratch_operands = 0 : i64, tpu.core_type = #tpu.core_type<tc>, window_params = [{transform_indices = @transform_0, window_bounds = array<i64: 8, 1>}, {transform_indices = @transform_1, window_bounds = array<i64: 8, 128>}, {pipeline_mode = #tpu.pipeline_mode<synchronous>, transform_indices = @transform_2, window_bounds = array<i64: 5, 128>}, {transform_indices = @transform_3, window_bounds = array<i64: 1, 1, 128>}]} {
    %c0 = arith.constant 0 : index
    %c0_0 = arith.constant 0 : index
    %0 = vector.load %arg2[%c0, %c0_0] : memref<8x128xf32, #tpu.memory_space<vmem>>, vector<8x128xf32>
    %c0_1 = arith.constant 0 : index
    %c0_2 = arith.constant 0 : index
    %1 = vector.load %arg3[%c0_1, %c0_2] : memref<5x128xf32, #tpu.memory_space<vmem>>, vector<5x128xf32>
    %c0_3 = arith.constant 0 : index
    %c0_4 = arith.constant 0 : index
    %2 = vector.load %arg1[%c0_3, %c0_4] : memref<8x1xi32, #tpu.memory_space<vmem>>, vector<8x1xi32>
    %3 = tpu.iota {dimensions = array<i32: 1>} : vector<8x5xi32>
    %4 = vector.broadcast %2 : vector<8x1xi32> to vector<8x5xi32>
    %5 = arith.cmpi eq, %4, %3 : vector<8x5xi32>
    %6 = arith.extui %5 : vector<8x5xi1> to vector<8x5xi32>
    %7 = arith.sitofp %6 : vector<8x5xi32> to vector<8x5xf32>
    %cst = arith.constant dense<0.000000e+00> : vector<8x128xf32>
    %8 = tpu.matmul %7, %1, %cst {dimension_numbers = #tpu.dot_dimension_numbers<[1], [0], [0], [1], [0, 0, 1, 1], [], []>} : vector<8x5xf32>, vector<5x128xf32>, vector<8x128xf32> -> vector<8x128xf32>
    %9 = arith.subf %0, %8 : vector<8x128xf32>
    %10 = arith.mulf %9, %9 : vector<8x128xf32>
    %cst_5 = arith.constant dense<0.000000e+00> : vector<128xf32>
    %11 = vector.multi_reduction <add>, %10, %cst_5 [0] : vector<8x128xf32> to vector<128xf32>
    %12 = vector.shape_cast %11 : vector<128xf32> to vector<1x128xf32>
    %c0_6 = arith.constant 0 : index
    %c0_7 = arith.constant 0 : index
    %c0_8 = arith.constant 0 : index
    %13 = vector.load %arg4[%c0_6, %c0_7, %c0_8] : memref<1x1x128xf32, #tpu.memory_space<vmem>>, vector<1x1x128xf32>
    %14 = vector.shape_cast %13 : vector<1x1x128xf32> to vector<1x128xf32>
    %15 = vector.shape_cast %12 : vector<1x128xf32> to vector<1x1x128xf32>
    tpu.vector_store %arg4[%c0_6, %c0_7, %c0_8], %15 {strides = array<i32>} : memref<1x1x128xf32, #tpu.memory_space<vmem>>, vector<1x1x128xf32>,
    return
  }
  func.func @transform_0(%arg0: i32) -> (i32, i32) {
    %c0_i32 = arith.constant 0 : i32
    %c0_i32_0 = arith.constant 0 : i32
    return %arg0, %c0_i32 : i32, i32
  }
  func.func @transform_1(%arg0: i32) -> (i32, i32) {
    %c0_i32 = arith.constant 0 : i32
    %c0_i32_0 = arith.constant 0 : i32
    return %arg0, %c0_i32 : i32, i32
  }
  func.func @transform_2(%arg0: i32) -> (i32, i32) {
    %c0_i32 = arith.constant 0 : i32
    %c0_i32_0 = arith.constant 0 : i32
    %c0_i32_1 = arith.constant 0 : i32
    return %c0_i32, %c0_i32_0 : i32, i32
  }
  func.func @transform_3(%arg0: i32) -> (i32, i32, i32) {
    %c0_i32 = arith.constant 0 : i32
    %c0_i32_0 = arith.constant 0 : i32
    %c0_i32_1 = arith.constant 0 : i32
    return %arg0, %c0_i32, %c0_i32_0 : i32, i32, i32
  }
}

</mosaic_0001>

<bundles_post_ra>
// kernel: tpu_custom_call.1
= control target key start
LH: loop header
LB: loop body
LE: loop exit
PB: predicated region body
PF: predicated region fallthrough
CT: control target
= control target key end

     0   :  { %8 = vsyncpa [#allocation3], 0  ;;  %s190_s0 = inlined_call_operand.vmem [shape: s32[8,1], index: 0, kind: input, shape index: {}]   ;;  %s191_s1 = inlined_call_operand.vmem [shape: f32[8,128], index: 1, kind: input, shape index: {}]   ;;  %s192_s2 = inlined_call_operand.hbm [shape: f32[5,128], index: 2, kind: input, shape index: {}]   ;;  %s193_s3 = inlined_call_operand.hbm [shape: f32[1,1,128], index: 3, kind: output, shape index: {}]  }
   0x1   :  { %9 = vsyncpa [#allocation4], 0  ;;  %s19_s14 = sshll.u32 %s192_s2, 4  ;;  %s154_s15 = smov [#allocation2]   ;;  %s20_s14 = int_to_ptr.hbm [resolvable:$true] %s19_s14 }
   0x2   :  { %s21_s16 = sshll.u32 %s154_s15, 4  ;;  %s22_s16 = int_to_ptr.vmem [resolvable:$true] %s21_s16 }
   0x3   :  { %24 = dma.hbm_to_vmem [thread:$0]  %s20_s14, 128, %s22_s16, [#allocation3]  }
   0x4   :  { %150 = dma.done.wait [#allocation3], 128  }
   0x5   :  { %151 = vsyncadd [#allocation3], 4294967168  ;;  %v155_v0 = vmov 0   ;;  %v31_v1 = vld [vmem:[%s190_s0] sm:$0xff]  ;;  %vm44_vm0 = vcmask 1044480   ;;  %v32_v3 = vlaneseq  ;;  %vm40_vm1 = vcmask 39936  }
   0x6   :  { %101 = vset.pattern.permute.xlu0 %v155_v0  ;;  %v30_v2 = vld [vmem:[#allocation2] sm:$0x1f]  ;;  %v156_v6 = vmov 0.0   ;;  %s157_s0 = smov [#allocation5]   ;;  %s84_s23 = sshll.u32 %s193_s3, 4  ;;  %s85_s23 = int_to_ptr.hbm [resolvable:$true] %s84_s23 }
   0x7   :  { %35 = vperm.xlu0 %101, %v31_v1   ;;  %95 = vmatpush.msk.msra.mxu0 %vm44_vm0, %v30_v2  ;;  %v33_v4 = vand.u32 127, %v32_v3  ;;  %v29_v8 = vld [vmem:[%s191_s1] sm:$0xff]  ;;  %s82_s20 = sshll.u32 %s157_s0, 4  ;;  %s83_s20 = int_to_ptr.vmem [resolvable:$true] %s82_s20 }
  0x79   :  { %v36_v5 = vpop.permute.xlu0 %35 }
  0x7a   :  { %vm37_vm2 = vcmp.eq.s32.totalorder %v36_v5, %v33_v4 }
  0x7b   :  { %v94_v7 = vsel %vm37_vm2, 1.0, %v156_v6 }
  0x7c   :  { %96 = vmatmul.msk.f32.vlgmr.msra.gmra.mxu0 %vm40_vm1, %v94_v7 }
  0xf9   :  { %v65_v9 = vpop.f32.mrf.mxu0 }
  0xfa   :  { %v68_v10 = vsub.f32 %v29_v8, %v65_v9 }
  0xfc   :  { %v69_v11 = vmul.f32 %v68_v10, %v68_v10 }
  0xfe   :  { %v70_v12 = vrot.slane %v69_v11, 4 }
 0x100   :  { %v71_v13 = vadd.f32 %v70_v12, %v69_v11 }
 0x102   :  { %v72_v14 = vrot.slane %v71_v13, 2 }
 0x104   :  { %v73_v15 = vadd.f32 %v72_v14, %v71_v13 }
 0x106   :  { %v74_v16 = vrot.slane %v73_v15, 1 }
 0x108   :  { %v75_v17 = vadd.f32 %v74_v16, %v73_v15 }
 0x10a   :  { %76 = vst [vmem:[#allocation5] sm:$0x1] %v75_v17 }
 0x10b   :  { %87 = dma.vmem_to_hbm [thread:$0]  %s83_s20, 16, %s85_s23, [#allocation4]  }
 0x10c   :  { %152 = dma.done.wait [#allocation4], 16  }
 0x10d   :  { %153 = vsyncadd [#allocation4], 4294967280 }
 0x10e   :  { %92 = vsyncpa [#allocation3], 1 }
 0x10f   :  { %93 = vsyncpa [#allocation4], 1 }

</bundles_post_ra>
